<compile_context>
chip_gen: v5e
topology: v5e:2x2
jax: 0.10.0
libtpu: 0.0.40
codegen_flags: <defaults>
</compile_context>

<pallas_src>
import functools
import math

import jax
import jax.numpy as jnp
from jax.experimental import pallas as pl
from jax.experimental.pallas import tpu as pltpu


def _round_up(x: int, m: int) -> int:
    return ((x + m - 1) // m) * m


def _cdiv(a: int, b: int) -> int:
    return -(-a // b)


def _device_hints():
    """Best-effort (num_tensorcores_per_chip, per-core VMEM budget bytes)."""
    num_tc, vmem_budget = 1, 100 * 2**20        # v5e/v6e: 1 TC, 128 MiB VMEM
    try:
        kind = jax.devices()[0].device_kind.lower()
    except Exception:  # pragma: no cover - defensive only
        return num_tc, vmem_budget
    if any(tag in kind for tag in ("v4", "v5p", "v7")):
        num_tc = 2                              # megacore / 2-TC parts
    if "v7" in kind:
        vmem_budget = 56 * 2**20                # v7x: only 64 MiB per TC
    return num_tc, vmem_budget


def _resolve_tiles(n, k, r, compute_dtype, out_dtype, tn=None, tk=None):
    """Pick (tn, tk, vmem_limit) for the fused fc6+fc7 kernel."""
    num_tc, vmem_budget = _device_hints()
    csize = jnp.dtype(compute_dtype).itemsize
    osize = jnp.dtype(out_dtype).itemsize
    pack = max(8, 32 // csize)                  # f32 -> 8, bf16 -> 16 sublanes

    # --- K tile: prefer a single step or a 128-multiple that divides K ------
    # so neither w6 nor x needs a wrapper-side zero-pad copy.
    tk_auto = tk is None
    if tk_auto:
        tk_cap = 2048
        if k <= tk_cap:
            tk = k                              # block == full dim: always legal
        else:
            tk = 0
            for cand in range(tk_cap, 127, -128):
                if k % cand == 0:               # e.g. K=12544 -> tk=1792
                    tk = cand
                    break
            if tk == 0:
                tk = 1792                       # fallback: K gets zero-padded

    # --- Row tile: one pass over w6 per TensorCore --------------------------
    tn_auto = tn is None
    if tn_auto:
        tn_cap = 1024
        if num_tc == 1 and n <= tn_cap:
            tn = n                              # single tile, no N padding
        else:
            tiles = max(num_tc, _cdiv(n, tn_cap))
            tn = min(_round_up(_cdiv(n, tiles), pack), _round_up(n, pack))

    def vmem_est(tn_):
        return (2 * tn_ * tk * csize            # x tile (double-buffered)
                + 2 * tk * r * csize            # w6 tile (double-buffered)
                + 2 * r * r * csize             # w7 (resident, 2 buffers)
                + 4 * r * 4                     # biases
                + tn_ * r * 4                   # f32 accumulator scratch
                + 2 * tn_ * r * osize)          # output tile (double-buffered)

    if tn_auto:
        while vmem_est(tn) > vmem_budget and tn > pack:
            tn = max(pack, _round_up(tn // 2, pack))

    est = vmem_est(tn)
    default_scoped = 16 * 2**20
    if est * 5 // 4 <= default_scoped:
        vmem_limit = None                       # default scoped limit suffices
    else:
        vmem_limit = int(min(max(est * 5 // 4 + (1 << 20), 32 * 2**20),
                             vmem_budget))
    return int(tn), int(tk), vmem_limit


def _two_mlp_kernel(x_ref, w6_ref, b6_ref, w7_ref, b7_ref, o_ref, acc_ref):
    """Fused fc6(+relu)+fc7(+relu) over one (tn, R) output tile.

    x_ref : (tn, tk)   K-slice of the flattened input rows
    w6_ref: (tk, R)    K-slice of fc6 weights (streamed over the K grid axis)
    b6_ref: (1, R)     fc6 bias            (VMEM resident, constant index_map)
    w7_ref: (R, R)     fc7 weights         (VMEM resident, constant index_map)
    b7_ref: (1, R)     fc7 bias            (VMEM resident, constant index_map)
    o_ref : (tn, R)    final output tile
    acc_ref: (tn, R)   f32 accumulator scratch for the fc6 K-reduction
    """
    k = pl.program_id(1)

    @pl.when(k == 0)
    def _():
        acc_ref[...] = jnp.zeros_like(acc_ref)

    # fc6 partial product for this K slice (MXU, f32 accumulation).
    acc_ref[...] += jnp.dot(
        x_ref[...], w6_ref[...], preferred_element_type=jnp.float32
    )

    @pl.when(k == pl.num_programs(1) - 1)
    def _():
        # fc6 epilogue in place: h = relu(acc + b6), stored back into acc_ref
        # so the bias/relu/cast/matmul chain has an explicit VMEM home.
        acc_ref[...] = jnp.maximum(
            acc_ref[...] + b6_ref[...].astype(jnp.float32), 0.0
        )
        # fc7: (tn, R) @ (R, R) entirely in VMEM, then bias + relu.
        y = jnp.dot(
            acc_ref[...].astype(w7_ref.dtype), w7_ref[...],
            preferred_element_type=jnp.float32,
        )
        o_ref[...] = jnp.maximum(
            y + b7_ref[...].astype(jnp.float32), 0.0
        ).astype(o_ref.dtype)


@functools.partial(
    jax.jit, static_argnames=("tn", "tk", "vmem_limit", "compute_dtype"))
def _two_mlp_head_impl(x, w6, b6, w7, b7, *, tn, tk, vmem_limit, compute_dtype):
    n = x.shape[0]
    x_flat = x.reshape(n, -1)                  # == torch.flatten(start_dim=1)
    k_dim = x_flat.shape[1]
    r_dim = w6.shape[1]
    out_dtype = x.dtype

    n_pad = _cdiv(n, tn) * tn
    k_pad = _cdiv(k_dim, tk) * tk

    # Zero-pad only when strictly needed (tk normally divides K exactly and a
    # single N tile uses tn == N, so the common paths are pad-free).
    if n_pad != n or k_pad != k_dim:
        x_flat = jnp.pad(x_flat, ((0, n_pad - n), (0, k_pad - k_dim)))
    if k_pad != k_dim:
        w6 = jnp.pad(w6, ((0, k_pad - k_dim), (0, 0)))

    x_c = x_flat.astype(compute_dtype)
    w6_c = w6.astype(compute_dtype)
    w7_c = w7.astype(compute_dtype)
    b6_f = b6.reshape(1, r_dim).astype(jnp.float32)
    b7_f = b7.reshape(1, r_dim).astype(jnp.float32)

    grid = (n_pad // tn, k_pad // tk)

    out_padded = pl.pallas_call(
        _two_mlp_kernel,
        out_shape=jax.ShapeDtypeStruct((n_pad, r_dim), out_dtype),
        grid=grid,
        in_specs=[
            pl.BlockSpec((tn, tk), lambda i, kk: (i, kk)),       # x: N x K stream
            pl.BlockSpec((tk, r_dim), lambda i, kk: (kk, 0)),    # w6: K stream
            pl.BlockSpec((1, r_dim), lambda i, kk: (0, 0)),      # b6: resident
            pl.BlockSpec((r_dim, r_dim), lambda i, kk: (0, 0)),  # w7: resident
            pl.BlockSpec((1, r_dim), lambda i, kk: (0, 0)),      # b7: resident
        ],
        out_specs=pl.BlockSpec((tn, r_dim), lambda i, kk: (i, 0)),
        scratch_shapes=[pltpu.VMEM((tn, r_dim), jnp.float32)],
        compiler_params=pltpu.CompilerParams(
            dimension_semantics=("parallel", "arbitrary"),
            vmem_limit_bytes=vmem_limit,
        ),
    )(x_c, w6_c, b6_f, w7_c, b7_f)

    return out_padded[:n] if n_pad != n else out_padded


def two_mlp_head(x, params, *, tn=None, tk=None, compute_dtype=jnp.bfloat16):
    """Forward pass of TwoMLPHead: flatten -> fc6+relu -> fc7+relu.

    x: (N, C, H, W).  params: w6 (K, R), b6 (R,), w7 (R, R), b7 (R,).
    compute_dtype: dtype for x / w6 / w7 on the MXU (default bf16; pass
    jnp.float32 or None for full-precision compute).  Accumulation and the
    bias/relu epilogues are always f32; output keeps x.dtype.
    """
    if compute_dtype is None:
        compute_dtype = x.dtype
    n = x.shape[0]
    k_dim = math.prod(x.shape[1:]) if len(x.shape) > 1 else 1
    r_dim = params["w6"].shape[1]
    tn, tk, vmem_limit = _resolve_tiles(
        n, k_dim, r_dim, compute_dtype, x.dtype, tn, tk)
    return _two_mlp_head_impl(
        x, params["w6"], params["b6"], params["w7"], params["b7"],
        tn=tn, tk=tk, vmem_limit=vmem_limit, compute_dtype=compute_dtype)


def init_params(key, in_channels, representation_size, dtype=jnp.float32):
    """Deterministic synthetic parameters (same Linear shapes as __init__).

    Weights stored as (in_features, out_features) == PyTorch weight.T.
    """
    k6w, k6b, k7w, k7b = jax.random.split(key, 4)
    s6 = 1.0 / jnp.sqrt(in_channels)
    s7 = 1.0 / jnp.sqrt(representation_size)
    return {
        "w6": jax.random.uniform(k6w, (in_channels, representation_size),
                                 dtype, -s6, s6),
        "b6": jax.random.uniform(k6b, (representation_size,), dtype, -s6, s6),
        "w7": jax.random.uniform(k7w, (representation_size, representation_size),
                                 dtype, -s7, s7),
        "b7": jax.random.uniform(k7b, (representation_size,), dtype, -s7, s7),
    }


if __name__ == "__main__":
    # Small shapes consistent with the module: x flattens to (N, C*H*W).
    N, C, H, W = 2, 4, 16, 16
    in_channels = C * H * W          # 1024
    representation_size = 128

    key = jax.random.PRNGKey(0)
    kx, kp = jax.random.split(key)
    x = jax.random.normal(kx, (N, C, H, W), dtype=jnp.float32)
    params = init_params(kp, in_channels, representation_size)

    x_flat = x.reshape(N, -1)

    # --- 1) full-precision compute path vs. plain-JAX f32 reference ---------
    out_f32 = jax.block_until_ready(
        two_mlp_head(x, params, compute_dtype=jnp.float32))
    ref_f32 = jnp.maximum(x_flat @ params["w6"] + params["b6"], 0.0)
    ref_f32 = jnp.maximum(ref_f32 @ params["w7"] + params["b7"], 0.0)
    assert out_f32.shape == (N, representation_size)
    assert jnp.allclose(out_f32, ref_f32, atol=5e-3, rtol=5e-3), (
        float(jnp.max(jnp.abs(out_f32 - ref_f32))))

    # --- 2) default bf16-compute path vs. a bf16-matched reference ----------
    out_bf = jax.block_until_ready(two_mlp_head(x, params))
    xb = x_flat.astype(jnp.bfloat16)
    w6b = params["w6"].astype(jnp.bfloat16)
    w7b = params["w7"].astype(jnp.bfloat16)
    h_ref = jnp.maximum(
        jnp.dot(xb, w6b, preferred_element_type=jnp.float32)
        + params["b6"].astype(jnp.float32), 0.0)
    ref_bf = jnp.maximum(
        jnp.dot(h_ref.astype(jnp.bfloat16), w7b,
                preferred_element_type=jnp.float32)
        + params["b7"].astype(jnp.float32), 0.0).astype(out_bf.dtype)
    assert out_bf.shape == (N, representation_size)
    assert jnp.allclose(out_bf, ref_bf, atol=2e-2, rtol=2e-2), (
        float(jnp.max(jnp.abs(out_bf - ref_bf))))

    print("KERNEL_OK")
</pallas_src>

<mosaic_0001>
module attributes {stable_mosaic.version = 11 : i64} {
  func.func @_two_mlp_kernel(%arg0: i32, %arg1: i32, %arg2: memref<2x1024xf32, #tpu.memory_space<vmem>>, %arg3: memref<1024x128xf32, #tpu.memory_space<vmem>>, %arg4: memref<1x128xf32, #tpu.memory_space<vmem>>, %arg5: memref<128x128xf32, #tpu.memory_space<vmem>>, %arg6: memref<1x128xf32, #tpu.memory_space<vmem>>, %arg7: memref<2x128xf32, #tpu.memory_space<vmem>>, %arg8: memref<2x128xf32, #tpu.memory_space<vmem>>) attributes {dimension_semantics = [#tpu.dimension_semantics<parallel>, #tpu.dimension_semantics<arbitrary>], iteration_bounds = array<i64: 1, 1>, scalar_prefetch = 0 : i64, scratch_operands = 1 : i64, tpu.core_type = #tpu.core_type<tc>, window_params = [{transform_indices = @transform_0, window_bounds = array<i64: 2, 1024>}, {transform_indices = @transform_1, window_bounds = array<i64: 1024, 128>}, {pipeline_mode = #tpu.pipeline_mode<synchronous>, transform_indices = @transform_2, window_bounds = array<i64: 1, 128>}, {pipeline_mode = #tpu.pipeline_mode<synchronous>, transform_indices = @transform_3, window_bounds = array<i64: 128, 128>}, {pipeline_mode = #tpu.pipeline_mode<synchronous>, transform_indices = @transform_4, window_bounds = array<i64: 1, 128>}, {transform_indices = @transform_5, window_bounds = array<i64: 2, 128>}]} {
    %c0_i32 = arith.constant 0 : i32
    %0 = arith.cmpi eq, %arg1, %c0_i32 : i32
    %1 = arith.extui %0 : i1 to i32
    %c0_i32_0 = arith.constant 0 : i32
    %2 = arith.cmpi ne, %1, %c0_i32_0 : i32
    scf.if %2 {
      %cst_10 = arith.constant 0.000000e+00 : f32
      %12 = vector.broadcast %cst_10 : f32 to vector<2x128xf32>
      %c0_11 = arith.constant 0 : index
      %c0_12 = arith.constant 0 : index
      %13 = vector.load %arg8[%c0_11, %c0_12] : memref<2x128xf32, #tpu.memory_space<vmem>>, vector<2x128xf32>
      tpu.vector_store %arg8[%c0_11, %c0_12], %12 {strides = array<i32>} : memref<2x128xf32, #tpu.memory_space<vmem>>, vector<2x128xf32>,
    } else {
    }
    %c0 = arith.constant 0 : index
    %c0_1 = arith.constant 0 : index
    %3 = vector.load %arg8[%c0, %c0_1] : memref<2x128xf32, #tpu.memory_space<vmem>>, vector<2x128xf32>
    %c0_2 = arith.constant 0 : index
    %c0_3 = arith.constant 0 : index
    %4 = vector.load %arg2[%c0_2, %c0_3] : memref<2x1024xf32, #tpu.memory_space<vmem>>, vector<2x1024xf32>
    %c0_4 = arith.constant 0 : index
    %c0_5 = arith.constant 0 : index
    %5 = vector.load %arg3[%c0_4, %c0_5] : memref<1024x128xf32, #tpu.memory_space<vmem>>, vector<1024x128xf32>
    %cst = arith.constant dense<0.000000e+00> : vector<2x128xf32>
    %6 = tpu.matmul %4, %5, %cst {dimension_numbers = #tpu.dot_dimension_numbers<[1], [0], [0], [1], [0, 0, 1, 1], [], []>} : vector<2x1024xf32>, vector<1024x128xf32>, vector<2x128xf32> -> vector<2x128xf32>
    %7 = arith.addf %3, %6 : vector<2x128xf32>
    %c0_6 = arith.constant 0 : index
    %c0_7 = arith.constant 0 : index
    %8 = vector.load %arg8[%c0_6, %c0_7] : memref<2x128xf32, #tpu.memory_space<vmem>>, vector<2x128xf32>
    tpu.vector_store %arg8[%c0_6, %c0_7], %7 {strides = array<i32>} : memref<2x128xf32, #tpu.memory_space<vmem>>, vector<2x128xf32>,
    %c0_i32_8 = arith.constant 0 : i32
    %9 = arith.cmpi eq, %arg1, %c0_i32_8 : i32
    %10 = arith.extui %9 : i1 to i32
    %c0_i32_9 = arith.constant 0 : i32
    %11 = arith.cmpi ne, %10, %c0_i32_9 : i32
    scf.if %11 {
      %c0_10 = arith.constant 0 : index
      %c0_11 = arith.constant 0 : index
      %12 = vector.load %arg8[%c0_10, %c0_11] : memref<2x128xf32, #tpu.memory_space<vmem>>, vector<2x128xf32>
      %c0_12 = arith.constant 0 : index
      %c0_13 = arith.constant 0 : index
      %13 = vector.load %arg4[%c0_12, %c0_13] : memref<1x128xf32, #tpu.memory_space<vmem>>, vector<1x128xf32>
      %14 = vector.broadcast %13 : vector<1x128xf32> to vector<2x128xf32>
      %15 = arith.addf %12, %14 : vector<2x128xf32>
      %cst_14 = arith.constant 0.000000e+00 : f32
      %16 = vector.broadcast %cst_14 : f32 to vector<2x128xf32>
      %17 = arith.maximumf %15, %16 : vector<2x128xf32>
      %c0_15 = arith.constant 0 : index
      %c0_16 = arith.constant 0 : index
      %18 = vector.load %arg8[%c0_15, %c0_16] : memref<2x128xf32, #tpu.memory_space<vmem>>, vector<2x128xf32>
      tpu.vector_store %arg8[%c0_15, %c0_16], %17 {strides = array<i32>} : memref<2x128xf32, #tpu.memory_space<vmem>>, vector<2x128xf32>,
      %c0_17 = arith.constant 0 : index
      %c0_18 = arith.constant 0 : index
      %19 = vector.load %arg8[%c0_17, %c0_18] : memref<2x128xf32, #tpu.memory_space<vmem>>, vector<2x128xf32>
      %c0_19 = arith.constant 0 : index
      %c0_20 = arith.constant 0 : index
      %20 = vector.load %arg5[%c0_19, %c0_20] : memref<128x128xf32, #tpu.memory_space<vmem>>, vector<128x128xf32>
      %cst_21 = arith.constant dense<0.000000e+00> : vector<2x128xf32>
      %21 = tpu.matmul %19, %20, %cst_21 {dimension_numbers = #tpu.dot_dimension_numbers<[1], [0], [0], [1], [0, 0, 1, 1], [], []>} : vector<2x128xf32>, vector<128x128xf32>, vector<2x128xf32> -> vector<2x128xf32>
      %c0_22 = arith.constant 0 : index
      %c0_23 = arith.constant 0 : index
      %22 = vector.load %arg6[%c0_22, %c0_23] : memref<1x128xf32, #tpu.memory_space<vmem>>, vector<1x128xf32>
      %23 = vector.broadcast %22 : vector<1x128xf32> to vector<2x128xf32>
      %24 = arith.addf %21, %23 : vector<2x128xf32>
      %cst_24 = arith.constant 0.000000e+00 : f32
      %25 = vector.broadcast %cst_24 : f32 to vector<2x128xf32>
      %26 = arith.maximumf %24, %25 : vector<2x128xf32>
      %c0_25 = arith.constant 0 : index
      %c0_26 = arith.constant 0 : index
      %27 = vector.load %arg7[%c0_25, %c0_26] : memref<2x128xf32, #tpu.memory_space<vmem>>, vector<2x128xf32>
      tpu.vector_store %arg7[%c0_25, %c0_26], %26 {strides = array<i32>} : memref<2x128xf32, #tpu.memory_space<vmem>>, vector<2x128xf32>,
    } else {
    }
    return
  }
  func.func @transform_0(%arg0: i32, %arg1: i32) -> (i32, i32) {
    %c0_i32 = arith.constant 0 : i32
    return %arg0, %arg1 : i32, i32
  }
  func.func @transform_1(%arg0: i32, %arg1: i32) -> (i32, i32) {
    %c0_i32 = arith.constant 0 : i32
    %c0_i32_0 = arith.constant 0 : i32
    return %arg1, %c0_i32 : i32, i32
  }
  func.func @transform_2(%arg0: i32, %arg1: i32) -> (i32, i32) {
    %c0_i32 = arith.constant 0 : i32
    %c0_i32_0 = arith.constant 0 : i32
    %c0_i32_1 = arith.constant 0 : i32
    return %c0_i32, %c0_i32_0 : i32, i32
  }
  func.func @transform_3(%arg0: i32, %arg1: i32) -> (i32, i32) {
    %c0_i32 = arith.constant 0 : i32
    %c0_i32_0 = arith.constant 0 : i32
    %c0_i32_1 = arith.constant 0 : i32
    return %c0_i32, %c0_i32_0 : i32, i32
  }
  func.func @transform_4(%arg0: i32, %arg1: i32) -> (i32, i32) {
    %c0_i32 = arith.constant 0 : i32
    %c0_i32_0 = arith.constant 0 : i32
    %c0_i32_1 = arith.constant 0 : i32
    return %c0_i32, %c0_i32_0 : i32, i32
  }
  func.func @transform_5(%arg0: i32, %arg1: i32) -> (i32, i32) {
    %c0_i32 = arith.constant 0 : i32
    %c0_i32_0 = arith.constant 0 : i32
    return %arg0, %c0_i32 : i32, i32
  }
}

</mosaic_0001>

<bundles_post_ra>
// kernel: _two_mlp_head_impl.1
= control target key start
LH: loop header
LB: loop body
LE: loop exit
PB: predicated region body
PF: predicated region fallthrough
CT: control target
= control target key end

     0   :  { %10 = vsyncpa [#allocation4], 0  ;;  %s587_s0 = inlined_call_operand.vmem [shape: f32[2,1024], index: 0, kind: input, shape index: {}]   ;;  %s588_s1 = inlined_call_operand.hbm [shape: f32[1024,128], index: 1, kind: input, shape index: {}]   ;;  %s589_s2 = inlined_call_operand.vmem [shape: f32[1,128], index: 2, kind: input, shape index: {}]   ;;  %s590_s3 = inlined_call_operand.vmem [shape: f32[128,128], index: 3, kind: input, shape index: {}]   ;;  %s591_s4 = inlined_call_operand.vmem [shape: f32[1,128], index: 4, kind: input, shape index: {}]   ;;  %s592_s5 = inlined_call_operand.hbm [shape: f32[2,128], index: 5, kind: output, shape index: {}]  }
   0x1   :  { %11 = vsyncpa [#allocation5], 0  ;;  %s18_s20 = sshll.u32 %s588_s1, 4  ;;  %s486_s21 = smov [#allocation3]   ;;  %s19_s20 = int_to_ptr.hbm [resolvable:$true] %s18_s20 }
   0x2   :  { %s20_s22 = sshll.u32 %s486_s21, 4  ;;  %s487_s23 = smov 128   ;;  %s21_s22 = int_to_ptr.vmem [resolvable:$true] %s20_s22 }
   0x3   :  { %s488_s24 = smov 8  }
   0x4   :  { %26 = dma.hbm_to_vmem [thread:$0]  %s19_s20, 16384, %s21_s22, [#allocation4], %s487_s23, %s487_s23, %s488_s24  }
   0x5   :  { %482 = dma.done.wait [#allocation4], 16384  }
   0x6   :  { %483 = vsyncadd [#allocation4], 4294950912  ;;  %v60_v0 = vld [vmem:[#allocation3 + $0x78] sm:$0xff]  ;;  %v59_v2 = vld [vmem:[#allocation3 + $0x70] sm:$0xff]  ;;  %s490_s10 = smov [#allocation6]   ;;  %s417_s14 = sshll.u32 %s592_s5, 4  ;;  %s418_s14 = int_to_ptr.hbm [resolvable:$true] %s417_s14 }
   0x7   :  { %v92_v1 = vld [vmem:[#allocation3 + $0x178] sm:$0xff]  ;;  %194 = vmatpush.msra.mxu0 %v60_v0  ;;  %v91_v4 = vld [vmem:[#allocation3 + $0x170] sm:$0xff]  ;;  %v58_v6 = vld [vmem:[#allocation3 + $0x68] sm:$0xff]  ;;  %s415_s11 = sshll.u32 %s490_s10, 4  ;;  %s416_s11 = int_to_ptr.vmem [resolvable:$true] %s415_s11 }
   0x8   :  { %234 = vmatpush.msra.mxu2 %v92_v1  ;;  %v76_v3 = vld [vmem:[#allocation3 + $0xf8] sm:$0xff]  ;;  %v75_v7 = vld [vmem:[#allocation3 + $0xf0] sm:$0xff]  ;;  %v90_v8 = vld [vmem:[#allocation3 + $0x168] sm:$0xff] }
   0x9   :  { %v108_v5 = vld [vmem:[#allocation3 + $0x1f8] sm:$0xff]  ;;  %214 = vmatpush.msra.mxu1 %v76_v3  ;;  %195 = vmatpush.msra.mxu0 %v59_v2  ;;  %v107_v9 = vld [vmem:[#allocation3 + $0x1f0] sm:$0xff]  ;;  %v74_v10 = vld [vmem:[#allocation3 + $0xe8] sm:$0xff] }
   0xa   :  { %254 = vmatpush.msra.mxu3 %v108_v5  ;;  %235 = vmatpush.msra.mxu2 %v91_v4  ;;  %v57_v11 = vld [vmem:[#allocation3 + $0x60] sm:$0xff]  ;;  %v106_v13 = vld [vmem:[#allocation3 + $0x1e8] sm:$0xff]  ;;  %v56_v16 = vld [vmem:[#allocation3 + $0x58] sm:$0xff] }
   0xb   :  { %215 = vmatpush.msra.mxu1 %v75_v7  ;;  %v89_v12 = vld [vmem:[#allocation3 + $0x160] sm:$0xff]  ;;  %196 = vmatpush.msra.mxu0 %v58_v6  ;;  %v88_v17 = vld [vmem:[#allocation3 + $0x158] sm:$0xff]  ;;  %v55_v20 = vld [vmem:[#allocation3 + $0x50] sm:$0xff] }
   0xc   :  { %255 = vmatpush.msra.mxu3 %v107_v9  ;;  %236 = vmatpush.msra.mxu2 %v90_v8  ;;  %v73_v14 = vld [vmem:[#allocation3 + $0xe0] sm:$0xff]  ;;  %v72_v18 = vld [vmem:[#allocation3 + $0xd8] sm:$0xff]  ;;  %v87_v21 = vld [vmem:[#allocation3 + $0x150] sm:$0xff] }
   0xd   :  { %v105_v15 = vld [vmem:[#allocation3 + $0x1e0] sm:$0xff]  ;;  %216 = vmatpush.msra.mxu1 %v74_v10  ;;  %197 = vmatpush.msra.mxu0 %v57_v11  ;;  %v104_v19 = vld [vmem:[#allocation3 + $0x1d8] sm:$0xff]  ;;  %v71_v22 = vld [vmem:[#allocation3 + $0xd0] sm:$0xff] }
   0xe   :  { %256 = vmatpush.msra.mxu3 %v106_v13  ;;  %237 = vmatpush.msra.mxu2 %v89_v12  ;;  %v103_v23 = vld [vmem:[#allocation3 + $0x1d0] sm:$0xff]  ;;  %v54_v24 = vld [vmem:[#allocation3 + $0x48] sm:$0xff]  ;;  %v53_v28 = vld [vmem:[#allocation3 + $0x40] sm:$0xff] }
   0xf   :  { %217 = vmatpush.msra.mxu1 %v73_v14  ;;  %198 = vmatpush.msra.mxu0 %v56_v16  ;;  %v86_v25 = vld [vmem:[#allocation3 + $0x148] sm:$0xff]  ;;  %v85_v29 = vld [vmem:[#allocation3 + $0x140] sm:$0xff]  ;;  %v52_v32 = vld [vmem:[#allocation3 + $0x38] sm:$0xff] }
  0x10   :  { %257 = vmatpush.msra.mxu3 %v105_v15  ;;  %238 = vmatpush.msra.mxu2 %v88_v17  ;;  %v70_v26 = vld [vmem:[#allocation3 + $0xc8] sm:$0xff]  ;;  %v69_v30 = vld [vmem:[#allocation3 + $0xc0] sm:$0xff]  ;;  %v84_v33 = vld [vmem:[#allocation3 + $0x138] sm:$0xff] }
  0x11   :  { %218 = vmatpush.msra.mxu1 %v72_v18  ;;  %199 = vmatpush.msra.mxu0 %v55_v20  ;;  %v102_v27 = vld [vmem:[#allocation3 + $0x1c8] sm:$0xff]  ;;  %v101_v31 = vld [vmem:[#allocation3 + $0x1c0] sm:$0xff]  ;;  %v68_v34 = vld [vmem:[#allocation3 + $0xb8] sm:$0xff] }
  0x12   :  { %258 = vmatpush.msra.mxu3 %v104_v19  ;;  %239 = vmatpush.msra.mxu2 %v87_v21  ;;  %v100_v35 = vld [vmem:[#allocation3 + $0x1b8] sm:$0xff]  ;;  %v51_v36 = vld [vmem:[#allocation3 + $0x30] sm:$0xff]  ;;  %v50_v40 = vld [vmem:[#allocation3 + $0x28] sm:$0xff] }
  0x13   :  { %219 = vmatpush.msra.mxu1 %v71_v22  ;;  %200 = vmatpush.msra.mxu0 %v54_v24  ;;  %v83_v37 = vld [vmem:[#allocation3 + $0x130] sm:$0xff]  ;;  %v82_v41 = vld [vmem:[#allocation3 + $0x128] sm:$0xff]  ;;  %v49_v44 = vld [vmem:[#allocation3 + $0x20] sm:$0xff] }
  0x14   :  { %259 = vmatpush.msra.mxu3 %v103_v23  ;;  %240 = vmatpush.msra.mxu2 %v86_v25  ;;  %v67_v38 = vld [vmem:[#allocation3 + $0xb0] sm:$0xff]  ;;  %v66_v42 = vld [vmem:[#allocation3 + $0xa8] sm:$0xff]  ;;  %v81_v45 = vld [vmem:[#allocation3 + $0x120] sm:$0xff] }
  0x15   :  { %220 = vmatpush.msra.mxu1 %v70_v26  ;;  %201 = vmatpush.msra.mxu0 %v53_v28  ;;  %v99_v39 = vld [vmem:[#allocation3 + $0x1b0] sm:$0xff]  ;;  %v98_v43 = vld [vmem:[#allocation3 + $0x1a8] sm:$0xff]  ;;  %v65_v46 = vld [vmem:[#allocation3 + $0xa0] sm:$0xff] }
  0x16   :  { %260 = vmatpush.msra.mxu3 %v102_v27  ;;  %241 = vmatpush.msra.mxu2 %v85_v29  ;;  %v97_v47 = vld [vmem:[#allocation3 + $0x1a0] sm:$0xff]  ;;  %v48_v48 = vld [vmem:[#allocation3 + $0x18] sm:$0xff]  ;;  %v47_v52 = vld [vmem:[#allocation3 + $0x10] sm:$0xff] }
  0x17   :  { %221 = vmatpush.msra.mxu1 %v69_v30  ;;  %202 = vmatpush.msra.mxu0 %v52_v32  ;;  %v80_v49 = vld [vmem:[#allocation3 + $0x118] sm:$0xff]  ;;  %v79_v53 = vld [vmem:[#allocation3 + $0x110] sm:$0xff]  ;;  %v46_v56 = vld [vmem:[#allocation3 + $0x8] sm:$0xff] }
  0x18   :  { %261 = vmatpush.msra.mxu3 %v101_v31  ;;  %242 = vmatpush.msra.mxu2 %v84_v33  ;;  %v64_v50 = vld [vmem:[#allocation3 + $0x98] sm:$0xff]  ;;  %v63_v54 = vld [vmem:[#allocation3 + $0x90] sm:$0xff]  ;;  %v78_v57 = vld [vmem:[#allocation3 + $0x108] sm:$0xff] }
  0x19   :  { %222 = vmatpush.msra.mxu1 %v68_v34  ;;  %203 = vmatpush.msra.mxu0 %v51_v36  ;;  %v96_v51 = vld [vmem:[#allocation3 + $0x198] sm:$0xff]  ;;  %v95_v55 = vld [vmem:[#allocation3 + $0x190] sm:$0xff]  ;;  %v62_v58 = vld [vmem:[#allocation3 + $0x88] sm:$0xff] }
  0x1a   :  { %262 = vmatpush.msra.mxu3 %v100_v35  ;;  %243 = vmatpush.msra.mxu2 %v83_v37  ;;  %v94_v59 = vld [vmem:[#allocation3 + $0x188] sm:$0xff]  ;;  %v45_v60 = vld [vmem:[#allocation3] sm:$0xff]  ;;  %v124_v62 = vld [vmem:[#allocation3 + $0x278] sm:$0xff] }
  0x1b   :  { %223 = vmatpush.msra.mxu1 %v67_v38  ;;  %204 = vmatpush.msra.mxu0 %v50_v40  ;;  %v77_v61 = vld [vmem:[#allocation3 + $0x100] sm:$0xff]  ;;  %v156_v63 = vld [vmem:[#allocation3 + $0x378] sm:$0xff]  ;;  %v123_v2 = vld [vmem:[#allocation3 + $0x270] sm:$0xff] }
  0x1c   :  { %263 = vmatpush.msra.mxu3 %v99_v39  ;;  %244 = vmatpush.msra.mxu2 %v82_v41  ;;  %v61_v0 = vld [vmem:[#allocation3 + $0x80] sm:$0xff]  ;;  %v140_v3 = vld [vmem:[#allocation3 + $0x2f8] sm:$0xff]  ;;  %v155_v4 = vld [vmem:[#allocation3 + $0x370] sm:$0xff] }
  0x1d   :  { %224 = vmatpush.msra.mxu1 %v66_v42  ;;  %205 = vmatpush.msra.mxu0 %v49_v44  ;;  %v93_v1 = vld [vmem:[#allocation3 + $0x180] sm:$0xff]  ;;  %v172_v5 = vld [vmem:[#allocation3 + $0x3f8] sm:$0xff]  ;;  %v122_v6 = vld [vmem:[#allocation3 + $0x268] sm:$0xff] }
  0x1e   :  { %264 = vmatpush.msra.mxu3 %v98_v43  ;;  %245 = vmatpush.msra.mxu2 %v81_v45  ;;  %v139_v7 = vld [vmem:[#allocation3 + $0x2f0] sm:$0xff]  ;;  %v154_v8 = vld [vmem:[#allocation3 + $0x368] sm:$0xff]  ;;  %v121_v10 = vld [vmem:[#allocation3 + $0x260] sm:$0xff] }
  0x1f   :  { %225 = vmatpush.msra.mxu1 %v65_v46  ;;  %206 = vmatpush.msra.mxu0 %v48_v48  ;;  %v171_v9 = vld [vmem:[#allocation3 + $0x3f0] sm:$0xff]  ;;  %v138_v11 = vld [vmem:[#allocation3 + $0x2e8] sm:$0xff]  ;;  %v153_v13 = vld [vmem:[#allocation3 + $0x360] sm:$0xff] }
  0x20   :  { %265 = vmatpush.msra.mxu3 %v97_v47  ;;  %246 = vmatpush.msra.mxu2 %v80_v49  ;;  %v43_v12 = vld [vmem:[%s587_s0] sm:$0xff]  ;;  %v170_v14 = vld [vmem:[#allocation3 + $0x3e8] sm:$0xff]  ;;  %v137_v16 = vld [vmem:[#allocation3 + $0x2e0] sm:$0xff] }
  0x21   :  { %226 = vmatpush.msra.mxu1 %v64_v50  ;;  %207 = vmatpush.msra.mxu0 %v47_v52  ;;  %175 = vst [vmem:[#allocation1] ss:$4 sm:$0xff] %v43_v12  ;;  %v120_v15 = vld [vmem:[#allocation3 + $0x258] sm:$0xff]  ;;  %v169_v18 = vld [vmem:[#allocation3 + $0x3e0] sm:$0xff]  ;;  %v119_v19 = vld [vmem:[#allocation3 + $0x250] sm:$0xff]  ;;  %v489_v12 = vmov 0.0  }
  0x22   :  { %266 = vmatpush.msra.mxu3 %v96_v51  ;;  %247 = vmatpush.msra.mxu2 %v79_v53  ;;  %v152_v17 = vld [vmem:[#allocation3 + $0x358] sm:$0xff]  ;;  %v151_v21 = vld [vmem:[#allocation3 + $0x350] sm:$0xff]  ;;  %v118_v23 = vld [vmem:[#allocation3 + $0x248] sm:$0xff]  ;;  %41 = vst [vmem:[#allocation2] sm:$0x3] %v489_v12 }
  0x23   :  { %227 = vmatpush.msra.mxu1 %v63_v54  ;;  %208 = vmatpush.msra.mxu0 %v46_v56  ;;  %v136_v20 = vld [vmem:[#allocation3 + $0x2d8] sm:$0xff]  ;;  %v135_v24 = vld [vmem:[#allocation3 + $0x2d0] sm:$0xff]  ;;  %v150_v25 = vld [vmem:[#allocation3 + $0x348] sm:$0xff] }
  0x24   :  { %267 = vmatpush.msra.mxu3 %v95_v55  ;;  %248 = vmatpush.msra.mxu2 %v78_v57  ;;  %v168_v22 = vld [vmem:[#allocation3 + $0x3d8] sm:$0xff]  ;;  %v167_v26 = vld [vmem:[#allocation3 + $0x3d0] sm:$0xff]  ;;  %v117_v28 = vld [vmem:[#allocation3 + $0x240] sm:$0xff] }
  0x25   :  { %228 = vmatpush.msra.mxu1 %v62_v58  ;;  %209 = vmatpush.msra.mxu0 %v45_v60  ;;  %v44_v27 = vld [vmem:[%s587_s0 + $0x8] sm:$0xff]  ;;  %v134_v29 = vld [vmem:[#allocation3 + $0x2c8] sm:$0xff]  ;;  %v115_v36 = vld [vmem:[#allocation3 + $0x230] sm:$0xff] }
  0x26   :  { %268 = vmatpush.msra.mxu3 %v94_v59  ;;  %249 = vmatpush.msra.mxu2 %v77_v61  ;;  %v149_v30 = vld [vmem:[#allocation3 + $0x340] sm:$0xff]  ;;  %v166_v31 = vld [vmem:[#allocation3 + $0x3c8] sm:$0xff]  ;;  %v116_v32 = vld [vmem:[#allocation3 + $0x238] sm:$0xff]  ;;  %177 = vst [vmem:[#allocation1 + $0x20] ss:$4 sm:$0xff] %v44_v27 }
  0x27   :  { %274 = vmatpush.msrb.mxu0 %v124_v62  ;;  %229 = vmatpush.msra.mxu1 %v61_v0  ;;  %v133_v33 = vld [vmem:[#allocation3 + $0x2c0] sm:$0xff]  ;;  %v148_v34 = vld [vmem:[#allocation3 + $0x338] sm:$0xff]  ;;  %v147_v38 = vld [vmem:[#allocation3 + $0x330] sm:$0xff] }
  0x28   :  { %314 = vmatpush.msrb.mxu2 %v156_v63  ;;  %269 = vmatpush.msra.mxu3 %v93_v1  ;;  %v165_v35 = vld [vmem:[#allocation3 + $0x3c0] sm:$0xff]  ;;  %v132_v37 = vld [vmem:[#allocation3 + $0x2b8] sm:$0xff]  ;;  %v114_v40 = vld [vmem:[#allocation3 + $0x228] sm:$0xff] }
  0x29   :  { %275 = vmatpush.msrb.mxu0 %v123_v2  ;;  %294 = vmatpush.msrb.mxu1 %v140_v3  ;;  %v164_v39 = vld [vmem:[#allocation3 + $0x3b8] sm:$0xff]  ;;  %v131_v41 = vld [vmem:[#allocation3 + $0x2b0] sm:$0xff]  ;;  %v146_v42 = vld [vmem:[#allocation3 + $0x328] sm:$0xff] }
  0x2a   :  { %315 = vmatpush.msrb.mxu2 %v155_v4  ;;  %334 = vmatpush.msrb.mxu3 %v172_v5  ;;  %v163_v43 = vld [vmem:[#allocation3 + $0x3b0] sm:$0xff]  ;;  %v180_v44 = vld.sshfl [vmem:[#allocation1 + $0x10] sm:$0xff pattern:$0x73625140]  ;;  %v112_v51 = vld [vmem:[#allocation3 + $0x218] sm:$0xff] }
  0x2b   :  { %276 = vmatpush.msrb.mxu0 %v122_v6  ;;  %295 = vmatpush.msrb.mxu1 %v139_v7  ;;  %v113_v45 = vld [vmem:[#allocation3 + $0x220] sm:$0xff]  ;;  %v130_v46 = vld [vmem:[#allocation3 + $0x2a8] sm:$0xff]  ;;  %v178_v49 = vld.sshfl [vmem:[#allocation1] sm:$0xff pattern:$0x73625140] }
  0x2c   :  { %316 = vmatpush.msrb.mxu2 %v154_v8  ;;  %335 = vmatpush.msrb.mxu3 %v171_v9  ;;  %v145_v47 = vld [vmem:[#allocation3 + $0x320] sm:$0xff]  ;;  %v162_v48 = vld [vmem:[#allocation3 + $0x3a8] sm:$0xff]  ;;  %v144_v53 = vld [vmem:[#allocation3 + $0x318] sm:$0xff] }
  0x2d   :  { %277 = vmatpush.msrb.mxu0 %v121_v10  ;;  %296 = vmatpush.msrb.mxu1 %v138_v11  ;;  %v181_v50 = vld.sshfl [vmem:[#allocation1 + $0x18] sm:$0xff pattern:$0x73625140]  ;;  %v129_v52 = vld [vmem:[#allocation3 + $0x2a0] sm:$0xff]  ;;  %v128_v57 = vld [vmem:[#allocation3 + $0x298] sm:$0xff] }
  0x2e   :  { %317 = vmatpush.msrb.mxu2 %v153_v13  ;;  %336 = vmatpush.msrb.mxu3 %v170_v14  ;;  %v161_v54 = vld [vmem:[#allocation3 + $0x3a0] sm:$0xff]  ;;  %v111_v56 = vld [vmem:[#allocation3 + $0x210] sm:$0xff]  ;;  %v160_v59 = vld [vmem:[#allocation3 + $0x398] sm:$0xff] }
  0x2f   :  { %278 = vmatpush.msrb.mxu0 %v120_v15  ;;  %297 = vmatpush.msrb.mxu1 %v137_v16  ;;  %v179_v55 = vld.sshfl [vmem:[#allocation1 + $0x8] sm:$0xff pattern:$0x73625140]  ;;  %v143_v58 = vld [vmem:[#allocation3 + $0x310] sm:$0xff]  ;;  %v110_v60 = vld [vmem:[#allocation3 + $0x208] sm:$0xff] }
  0x30   :  { %318 = vmatpush.msrb.mxu2 %v152_v17  ;;  %337 = vmatpush.msrb.mxu3 %v169_v18  ;;  %v127_v61 = vld [vmem:[#allocation3 + $0x290] sm:$0xff]  ;;  %v142_v62 = vld [vmem:[#allocation3 + $0x308] sm:$0xff]  ;;  %v109_v0 = vld [vmem:[#allocation3 + $0x200] sm:$0xff] }
  0x31   :  { %279 = vmatpush.msrb.mxu0 %v119_v19  ;;  %298 = vmatpush.msrb.mxu1 %v136_v20  ;;  %v159_v63 = vld [vmem:[#allocation3 + $0x390] sm:$0xff]  ;;  %v126_v1 = vld [vmem:[#allocation3 + $0x288] sm:$0xff]  ;;  %v141_v2 = vld [vmem:[#allocation3 + $0x300] sm:$0xff] }
  0x32   :  { %319 = vmatpush.msrb.mxu2 %v151_v21  ;;  %338 = vmatpush.msrb.mxu3 %v168_v22  ;;  %v158_v3 = vld [vmem:[#allocation3 + $0x388] sm:$0xff]  ;;  %v182_v4 = vld.sshfl [vmem:[#allocation1 + $0x20] sm:$0xff pattern:$0x73625140]  ;;  %v125_v6 = vld [vmem:[#allocation3 + $0x280] sm:$0xff] }
  0x33   :  { %280 = vmatpush.msrb.mxu0 %v118_v23  ;;  %299 = vmatpush.msrb.mxu1 %v135_v24  ;;  %v184_v5 = vld.sshfl [vmem:[#allocation1 + $0x30] sm:$0xff pattern:$0x73625140]  ;;  %v183_v8 = vld.sshfl [vmem:[#allocation1 + $0x28] sm:$0xff pattern:$0x73625140] }
  0x34   :  { %320 = vmatpush.msrb.mxu2 %v150_v25  ;;  %339 = vmatpush.msrb.mxu3 %v167_v26  ;;  %v157_v7 = vld [vmem:[#allocation3 + $0x380] sm:$0xff]  ;;  %v185_v9 = vld.sshfl [vmem:[#allocation1 + $0x38] sm:$0xff pattern:$0x73625140]  ;;  %v380_v14 = vld [vmem:[%s590_s3 + $0x60] sm:$0xff] }
  0x35   :  { %281 = vmatpush.msrb.mxu0 %v117_v28  ;;  %300 = vmatpush.msrb.mxu1 %v134_v29  ;;  %v383_v10 = vld [vmem:[%s590_s3 + $0x78] sm:$0xff]  ;;  %v382_v11 = vld [vmem:[%s590_s3 + $0x70] sm:$0xff]  ;;  %v381_v13 = vld [vmem:[%s590_s3 + $0x68] sm:$0xff] }
  0x36   :  { %321 = vmatpush.msrb.mxu2 %v149_v30  ;;  %340 = vmatpush.msrb.mxu3 %v166_v31  ;;  %v379_v15 = vld [vmem:[%s590_s3 + $0x58] sm:$0xff]  ;;  %v378_v16 = vld [vmem:[%s590_s3 + $0x50] sm:$0xff]  ;;  %v377_v17 = vld [vmem:[%s590_s3 + $0x48] sm:$0xff] }
  0x37   :  { %282 = vmatpush.msrb.mxu0 %v116_v32  ;;  %301 = vmatpush.msrb.mxu1 %v133_v33  ;;  %v376_v18 = vld [vmem:[%s590_s3 + $0x40] sm:$0xff]  ;;  %v375_v19 = vld [vmem:[%s590_s3 + $0x38] sm:$0xff]  ;;  %v374_v20 = vld [vmem:[%s590_s3 + $0x30] sm:$0xff] }
  0x38   :  { %322 = vmatpush.msrb.mxu2 %v148_v34  ;;  %341 = vmatpush.msrb.mxu3 %v165_v35  ;;  %v373_v21 = vld [vmem:[%s590_s3 + $0x28] sm:$0xff]  ;;  %v372_v23 = vld [vmem:[%s590_s3 + $0x20] sm:$0xff]  ;;  %v371_v25 = vld [vmem:[%s590_s3 + $0x18] sm:$0xff] }
  0x39   :  { %283 = vmatpush.msrb.mxu0 %v115_v36  ;;  %302 = vmatpush.msrb.mxu1 %v132_v37  ;;  %v370_v26 = vld [vmem:[%s590_s3 + $0x10] sm:$0xff]  ;;  %v369_v29 = vld [vmem:[%s590_s3 + $0x8] sm:$0xff]  ;;  %v368_v32 = vld [vmem:[%s590_s3] sm:$0xff] }
  0x3a   :  { %323 = vmatpush.msrb.mxu2 %v147_v38  ;;  %342 = vmatpush.msrb.mxu3 %v164_v39 }
  0x3b   :  { %284 = vmatpush.msrb.mxu0 %v114_v40  ;;  %303 = vmatpush.msrb.mxu1 %v131_v41  ;;  %v42_v40 = vld [vmem:[#allocation2] sm:$0x3] }
  0x3c   :  { %324 = vmatpush.msrb.mxu2 %v146_v42  ;;  %343 = vmatpush.msrb.mxu3 %v163_v43 }
  0x3d   :  { %250 = vmatmul.f32.vlgmr.msra.gmra.mxu2 %v180_v44  ;;  %285 = vmatpush.msrb.mxu0 %v113_v45  ;;  %v432_v44 = vld [vmem:[%s589_s2] ss:$0 sm:$0xff] }
  0x3e   :  { %304 = vmatpush.msrb.mxu1 %v130_v46  ;;  %325 = vmatpush.msrb.mxu2 %v145_v47 }
  0x3f   :  { %344 = vmatpush.msrb.mxu3 %v162_v48  ;;  %210 = vmatmul.f32.vlgmr.msra.gmra.mxu0 %v178_v49  ;;  %v433_v49 = vld [vmem:[%s591_s4] ss:$0 sm:$0xff] }
  0x40   :  { %270 = vmatmul.f32.vlgmr.msra.gmra.mxu3 %v181_v50  ;;  %286 = vmatpush.msrb.mxu0 %v112_v51 }
  0x41   :  { %305 = vmatpush.msrb.mxu1 %v129_v52  ;;  %326 = vmatpush.msrb.mxu2 %v144_v53 }
  0x42   :  { %345 = vmatpush.msrb.mxu3 %v161_v54  ;;  %230 = vmatmul.f32.vlgmr.msra.gmra.mxu1 %v179_v55 }
  0x43   :  { %287 = vmatpush.msrb.mxu0 %v111_v56  ;;  %306 = vmatpush.msrb.mxu1 %v128_v57 }
  0x44   :  { %327 = vmatpush.msrb.mxu2 %v143_v58  ;;  %346 = vmatpush.msrb.mxu3 %v160_v59 }
  0x45   :  { %288 = vmatpush.msrb.mxu0 %v110_v60  ;;  %307 = vmatpush.msrb.mxu1 %v127_v61 }
  0x46   :  { %328 = vmatpush.msrb.mxu2 %v142_v62  ;;  %347 = vmatpush.msrb.mxu3 %v159_v63 }
  0x47   :  { %289 = vmatpush.msrb.mxu0 %v109_v0  ;;  %308 = vmatpush.msrb.mxu1 %v126_v1 }
  0x48   :  { %329 = vmatpush.msrb.mxu2 %v141_v2  ;;  %348 = vmatpush.msrb.mxu3 %v158_v3 }
  0x49   :  { %290 = vmatmul.f32.vlgmr.msrb.gmra.mxu0 %v182_v4  ;;  %330 = vmatmul.f32.vlgmr.msrb.gmra.mxu2 %v184_v5 }
  0x4a   :  { %309 = vmatpush.msrb.mxu1 %v125_v6  ;;  %349 = vmatpush.msrb.mxu3 %v157_v7 }
  0x4b   :  { %310 = vmatmul.f32.vlgmr.msrb.gmra.mxu1 %v183_v8  ;;  %350 = vmatmul.f32.vlgmr.msrb.gmra.mxu3 %v185_v9 }
  0x4c   :  { %388 = vmatpush.msra.mxu0 %v383_v10 }
  0x4e   :  { %389 = vmatpush.msra.mxu0 %v382_v11 }
  0x50   :  { %390 = vmatpush.msra.mxu0 %v381_v13 }
  0x52   :  { %391 = vmatpush.msra.mxu0 %v380_v14 }
  0x54   :  { %392 = vmatpush.msra.mxu0 %v379_v15 }
  0x56   :  { %393 = vmatpush.msra.mxu0 %v378_v16 }
  0x58   :  { %394 = vmatpush.msra.mxu0 %v377_v17 }
  0x5a   :  { %395 = vmatpush.msra.mxu0 %v376_v18 }
  0x5c   :  { %396 = vmatpush.msra.mxu0 %v375_v19 }
  0x5e   :  { %397 = vmatpush.msra.mxu0 %v374_v20 }
  0x60   :  { %398 = vmatpush.msra.mxu0 %v373_v21 }
  0x62   :  { %399 = vmatpush.msra.mxu0 %v372_v23 }
  0x64   :  { %400 = vmatpush.msra.mxu0 %v371_v25 }
  0x66   :  { %401 = vmatpush.msra.mxu0 %v370_v26 }
  0x68   :  { %402 = vmatpush.msra.mxu0 %v369_v29 }
  0x6a   :  { %403 = vmatpush.msra.mxu0 %v368_v32 }
  0xbc   :  { %v211_v22 = vpop.f32.mrf.mxu0 }
  0xbf   :  { %v231_v24 = vpop.f32.mrf.mxu1 }
  0xc0   :  { %v232_v27 = vadd.f32 %v231_v24, %v211_v22  ;;  %v251_v28 = vpop.f32.mrf.mxu2 }
  0xc2   :  { %v252_v30 = vadd.f32 %v251_v28, %v232_v27 }
  0xc3   :  { %v271_v31 = vpop.f32.mrf.mxu3 }
  0xc4   :  { %v272_v33 = vadd.f32 %v271_v31, %v252_v30 }
  0xc6   :  { %v291_v34 = vpop.f32.mrf.mxu0 }
  0xc7   :  { %v292_v35 = vadd.f32 %v291_v34, %v272_v33 }
  0xc8   :  { %v311_v36 = vpop.f32.mrf.mxu1 }
  0xc9   :  { %v312_v37 = vadd.f32 %v311_v36, %v292_v35 }
  0xcc   :  { %v331_v38 = vpop.f32.mrf.mxu2 }
  0xcd   :  { %v332_v39 = vadd.f32 %v331_v38, %v312_v37 }
  0xce   :  { %v351_v41 = vpop.f32.mrf.mxu3 }
  0xcf   :  { %v352_v42 = vadd.f32 %v351_v41, %v332_v39 }
  0xd1   :  { %v354_v43 = vadd.f32 %v352_v42, %v42_v40 }
  0xd3   :  { %355 = vst [vmem:[#allocation2] sm:$0x3] %v354_v43 }
  0xda   :  { %v359_v45 = vld [vmem:[#allocation2] sm:$0x3] }
  0xdb   :  { %v364_v46 = vadd.f32 %v432_v44, %v359_v45 }
  0xdd   :  { %v365_v47 = vmax.f32 %v364_v46, 0.0 }
  0xdf   :  { %366 = vst [vmem:[#allocation2] sm:$0x3] %v365_v47 }
  0xe6   :  { %v367_v48 = vld [vmem:[#allocation2] sm:$0x3] }
  0xe7   :  { %404 = vmatmul.f32.vlgmr.msra.gmra.mxu0 %v367_v48 }
 0x164   :  { %v405_v50 = vpop.f32.mrf.mxu0 }
 0x165   :  { %v406_v51 = vadd.f32 %v433_v49, %v405_v50 }
 0x167   :  { %v408_v52 = vmax.f32 %v406_v51, 0.0 }
 0x169   :  { %409 = vst [vmem:[#allocation6] sm:$0x3] %v408_v52 }
 0x16a   :  { %420 = dma.vmem_to_hbm [thread:$0]  %s416_s11, 32, %s418_s14, [#allocation5]  }
 0x16b   :  { %484 = dma.done.wait [#allocation5], 32  }
 0x16c   :  { %485 = vsyncadd [#allocation5], 4294967264 }
 0x16d   :  { %425 = vsyncpa [#allocation4], 1 }
 0x16e   :  { %426 = vsyncpa [#allocation5], 1 }

</bundles_post_ra>
